<compile_context>
chip_gen: v7x
topology: tpu7x:2x2x1
jax: 0.10.0
libtpu: 0.0.40
codegen_flags: <defaults>
</compile_context>

<pallas_src>
import functools

import jax
import jax.numpy as jnp
from jax.experimental import pallas as pl
from jax.experimental.pallas import tpu as pltpu


def _fused_conv_kernel(x_ref, w_ref, cb_ref, eb_ref, o_ref, *, K, W,
                       constant_value, scaling_factor):
    """Whole problem in one invocation; one fused MXU dot per image.

    x_ref : (N, Cp, Xpad)     zero-padded flat images (Cp = Cin rounded to 8,
                              Xpad >= P + (K-1)*(W+1) so tap slices stay in-bounds)
    w_ref : (Cout, K*K*Cp)    conv weights, tap-major / channel-minor, zero
                              columns for the channel padding
    cb_ref: (Cout, 1)         conv bias
    eb_ref: (Cout, 1)         extra bias, pre-multiplied by scaling_factor
    o_ref : (N, Cout, P)      P = lane-rounded H*W flat output (garbage columns
                              with h >= Ho or w >= Wo are cropped outside)
    """
    N = x_ref.shape[0]
    P = o_ref.shape[-1]

    w = w_ref[...]            # (Cout, K*K*Cp)
    cb = cb_ref[...]          # (Cout, 1) — broadcasts along lanes
    eb = eb_ref[...]          # (Cout, 1)

    for n in range(N):        # N is tiny and static: unroll
        xn = x_ref[n]         # (Cp, Xpad)
        # "im2col" as K*K statically lane-shifted slices stacked on the
        # sublane axis; each piece is a full 8-sublane tile so the stack is
        # tile-aligned and cheap (lane shifts go to the idle XLU slot).
        taps = jnp.concatenate(
            [xn[:, kh * W + kw: kh * W + kw + P]
             for kh in range(K) for kw in range(K)],
            axis=0)                                           # (K*K*Cp, P)
        acc = jnp.dot(w, taps, preferred_element_type=jnp.float32)  # (Cout, P)
        acc = acc + cb                                        # conv bias
        acc = jnp.minimum(acc, constant_value)                # min with constant
        acc = acc * scaling_factor + eb                       # (y+b)*s == y*s + b*s
        o_ref[n] = acc.astype(o_ref.dtype)


@functools.partial(jax.jit, static_argnames=("constant_value", "scaling_factor"))
def fused_conv_min_bias_scale(x, conv_w, conv_b, extra_bias, constant_value,
                              scaling_factor):
    """x: (N, Cin, H, W) f32; conv_w: (Cout, Cin, K, K). Returns (N, Cout, Ho, Wo)."""
    N, Cin, H, W = x.shape
    Cout, Cin2, KH, KW = conv_w.shape
    assert Cin2 == Cin and KH == KW
    K = KH
    Ho, Wo = H - K + 1, W - K + 1
    HW = H * W

    # Lane-dense output width (multiple of 128 -> unmasked stores) covering the
    # full flattened image; columns with w >= Wo or h >= Ho are garbage.
    P = pl.cdiv(HW, 128) * 128
    max_off = (K - 1) * W + (K - 1)               # largest static tap offset
    Xpad = pl.cdiv(P + max_off, 128) * 128        # padded flat-image width
    Cp = pl.cdiv(Cin, 8) * 8                      # sublane-aligned channels

    # Static safety checks (no runtime bounds checks on VMEM refs):
    #  * every tap slice [off, off+P) lies inside the padded image
    #  * every VALID output column reads only real (un-padded) pixels:
    #    (Ho-1)*W + (Wo-1) + max_off == H*W - 1 for stride-1 square VALID conv.
    assert P + max_off <= Xpad
    assert (Ho - 1) * W + (Wo - 1) + max_off == HW - 1

    # Cheap host-side re-layouts only (no im2col patch duplication):
    x_flat = x.reshape(N, Cin, HW)                                   # free collapse
    x_pad = jnp.pad(x_flat, ((0, 0), (0, Cp - Cin), (0, Xpad - HW)))  # ~12 KB
    w_taps = conv_w.transpose(0, 2, 3, 1)                            # (Cout,K,K,Cin)
    w_taps = jnp.pad(w_taps, ((0, 0), (0, 0), (0, 0), (0, Cp - Cin)))
    w_fused = w_taps.reshape(Cout, K * K * Cp).astype(jnp.float32)   # (Cout, 72)
    cb = conv_b.reshape(Cout, 1).astype(jnp.float32)
    eb = extra_bias.reshape(Cout, 1).astype(jnp.float32) * scaling_factor

    kernel = functools.partial(_fused_conv_kernel, K=K, W=W,
                               constant_value=float(constant_value),
                               scaling_factor=float(scaling_factor))

    out_flat = pl.pallas_call(
        kernel,
        out_shape=jax.ShapeDtypeStruct((N, Cout, P), jnp.float32),
        in_specs=[
            pl.BlockSpec(memory_space=pltpu.MemorySpace.VMEM),   # x (padded, flat)
            pl.BlockSpec(memory_space=pltpu.MemorySpace.VMEM),   # fused weights
            pl.BlockSpec(memory_space=pltpu.MemorySpace.VMEM),   # conv bias
            pl.BlockSpec(memory_space=pltpu.MemorySpace.VMEM),   # scaled extra bias
        ],
        out_specs=pl.BlockSpec(memory_space=pltpu.MemorySpace.VMEM),
    )(x_pad, w_fused, cb, eb)

    # (N, Cout, P) -> real H*W columns -> (N, Cout, H, W) -> valid crop.
    out = out_flat[:, :, :HW].reshape(N, Cout, H, W)[:, :, :Ho, :Wo]
    return out


def reference(x, conv_w, conv_b, extra_bias, constant_value, scaling_factor):
    y = jax.lax.conv_general_dilated(
        x, conv_w, window_strides=(1, 1), padding="VALID",
        dimension_numbers=("NCHW", "OIHW", "NCHW"))
    y = y + conv_b.reshape(1, -1, 1, 1)
    y = jnp.minimum(y, constant_value)
    y = (y + extra_bias.reshape(1, -1, 1, 1)) * scaling_factor
    return y


if __name__ == "__main__":
    # Small shapes consistent with the module's forward.
    N, Cin, H, W = 2, 4, 16, 16
    Cout, K = 8, 3
    constant_value = 0.5
    scaling_factor = 2.0
    bias_shape = (Cout, 1, 1)

    key = jax.random.PRNGKey(0)
    k1, k2, k3, k4 = jax.random.split(key, 4)

    x = jax.random.normal(k1, (N, Cin, H, W), jnp.float32)
    conv_w = jax.random.normal(k2, (Cout, Cin, K, K), jnp.float32) * 0.1
    conv_b = jax.random.normal(k3, (Cout,), jnp.float32) * 0.1
    extra_bias = jax.random.normal(k4, bias_shape, jnp.float32)

    out = fused_conv_min_bias_scale(x, conv_w, conv_b, extra_bias,
                                    constant_value, scaling_factor)
    out = jax.block_until_ready(out)

    ref = reference(x, conv_w, conv_b, extra_bias, constant_value,
                    scaling_factor)
    assert out.shape == (N, Cout, H - K + 1, W - K + 1)
    assert jnp.allclose(out, ref, atol=1e-4, rtol=1e-4), "mismatch vs reference"

    print("KERNEL_OK")
</pallas_src>

<mosaic_0001>
module attributes {stable_mosaic.version = 11 : i64} {
  func.func @_fused_conv_kernel(%arg0: memref<2x8x384xf32, #tpu.memory_space<vmem>>, %arg1: memref<8x72xf32, #tpu.memory_space<vmem>>, %arg2: memref<8x1xf32, #tpu.memory_space<vmem>>, %arg3: memref<8x1xf32, #tpu.memory_space<vmem>>, %arg4: memref<2x8x256xf32, #tpu.memory_space<vmem>>) attributes {dimension_semantics = [], scalar_prefetch = 0 : i64, scratch_operands = 0 : i64, tpu.core_type = #tpu.core_type<tc>} {
    %c0 = arith.constant 0 : index
    %c0_0 = arith.constant 0 : index
    %0 = vector.load %arg1[%c0, %c0_0] : memref<8x72xf32, #tpu.memory_space<vmem>>, vector<8x72xf32>
    %c0_1 = arith.constant 0 : index
    %c0_2 = arith.constant 0 : index
    %1 = vector.load %arg2[%c0_1, %c0_2] : memref<8x1xf32, #tpu.memory_space<vmem>>, vector<8x1xf32>
    %c0_3 = arith.constant 0 : index
    %c0_4 = arith.constant 0 : index
    %2 = vector.load %arg3[%c0_3, %c0_4] : memref<8x1xf32, #tpu.memory_space<vmem>>, vector<8x1xf32>
    %c0_5 = arith.constant 0 : index
    %c0_6 = arith.constant 0 : index
    %c0_7 = arith.constant 0 : index
    %3 = vector.load %arg0[%c0_5, %c0_6, %c0_7] : memref<2x8x384xf32, #tpu.memory_space<vmem>>, vector<1x8x384xf32>
    %4 = vector.shape_cast %3 : vector<1x8x384xf32> to vector<8x384xf32>
    %5 = vector.extract_strided_slice %4 {offsets = [0, 0], sizes = [8, 256], strides = [1, 1]} : vector<8x384xf32> to vector<8x256xf32>
    %6 = vector.extract_strided_slice %4 {offsets = [0, 1], sizes = [8, 256], strides = [1, 1]} : vector<8x384xf32> to vector<8x256xf32>
    %7 = vector.extract_strided_slice %4 {offsets = [0, 2], sizes = [8, 256], strides = [1, 1]} : vector<8x384xf32> to vector<8x256xf32>
    %8 = vector.extract_strided_slice %4 {offsets = [0, 16], sizes = [8, 256], strides = [1, 1]} : vector<8x384xf32> to vector<8x256xf32>
    %9 = vector.extract_strided_slice %4 {offsets = [0, 17], sizes = [8, 256], strides = [1, 1]} : vector<8x384xf32> to vector<8x256xf32>
    %10 = vector.extract_strided_slice %4 {offsets = [0, 18], sizes = [8, 256], strides = [1, 1]} : vector<8x384xf32> to vector<8x256xf32>
    %11 = vector.extract_strided_slice %4 {offsets = [0, 32], sizes = [8, 256], strides = [1, 1]} : vector<8x384xf32> to vector<8x256xf32>
    %12 = vector.extract_strided_slice %4 {offsets = [0, 33], sizes = [8, 256], strides = [1, 1]} : vector<8x384xf32> to vector<8x256xf32>
    %13 = vector.extract_strided_slice %4 {offsets = [0, 34], sizes = [8, 256], strides = [1, 1]} : vector<8x384xf32> to vector<8x256xf32>
    %14 = tpu.concatenate %5, %6, %7, %8, %9, %10, %11, %12, %13 in 0 : vector<8x256xf32>, vector<8x256xf32>, vector<8x256xf32>, vector<8x256xf32>, vector<8x256xf32>, vector<8x256xf32>, vector<8x256xf32>, vector<8x256xf32>, vector<8x256xf32> -> vector<72x256xf32>
    %cst = arith.constant dense<0.000000e+00> : vector<8x256xf32>
    %15 = tpu.matmul %0, %14, %cst {dimension_numbers = #tpu.dot_dimension_numbers<[1], [0], [0], [1], [0, 0, 1, 1], [], []>} : vector<8x72xf32>, vector<72x256xf32>, vector<8x256xf32> -> vector<8x256xf32>
    %16 = vector.broadcast %1 : vector<8x1xf32> to vector<8x256xf32>
    %17 = arith.addf %15, %16 : vector<8x256xf32>
    %cst_8 = arith.constant 5.000000e-01 : f32
    %18 = vector.broadcast %cst_8 : f32 to vector<8x256xf32>
    %19 = arith.minimumf %17, %18 : vector<8x256xf32>
    %cst_9 = arith.constant 2.000000e+00 : f32
    %20 = vector.broadcast %cst_9 : f32 to vector<8x256xf32>
    %21 = arith.mulf %19, %20 : vector<8x256xf32>
    %22 = vector.broadcast %2 : vector<8x1xf32> to vector<8x256xf32>
    %23 = arith.addf %21, %22 : vector<8x256xf32>
    %c0_10 = arith.constant 0 : index
    %c0_11 = arith.constant 0 : index
    %c0_12 = arith.constant 0 : index
    %24 = vector.load %arg4[%c0_10, %c0_11, %c0_12] : memref<2x8x256xf32, #tpu.memory_space<vmem>>, vector<1x8x256xf32>
    %25 = vector.shape_cast %24 : vector<1x8x256xf32> to vector<8x256xf32>
    %26 = vector.shape_cast %23 : vector<8x256xf32> to vector<1x8x256xf32>
    tpu.vector_store %arg4[%c0_10, %c0_11, %c0_12], %26 {strides = array<i32>} : memref<2x8x256xf32, #tpu.memory_space<vmem>>, vector<1x8x256xf32>,
    %c1 = arith.constant 1 : index
    %c0_13 = arith.constant 0 : index
    %c0_14 = arith.constant 0 : index
    %27 = vector.load %arg0[%c1, %c0_13, %c0_14] : memref<2x8x384xf32, #tpu.memory_space<vmem>>, vector<1x8x384xf32>
    %28 = vector.shape_cast %27 : vector<1x8x384xf32> to vector<8x384xf32>
    %29 = vector.extract_strided_slice %28 {offsets = [0, 0], sizes = [8, 256], strides = [1, 1]} : vector<8x384xf32> to vector<8x256xf32>
    %30 = vector.extract_strided_slice %28 {offsets = [0, 1], sizes = [8, 256], strides = [1, 1]} : vector<8x384xf32> to vector<8x256xf32>
    %31 = vector.extract_strided_slice %28 {offsets = [0, 2], sizes = [8, 256], strides = [1, 1]} : vector<8x384xf32> to vector<8x256xf32>
    %32 = vector.extract_strided_slice %28 {offsets = [0, 16], sizes = [8, 256], strides = [1, 1]} : vector<8x384xf32> to vector<8x256xf32>
    %33 = vector.extract_strided_slice %28 {offsets = [0, 17], sizes = [8, 256], strides = [1, 1]} : vector<8x384xf32> to vector<8x256xf32>
    %34 = vector.extract_strided_slice %28 {offsets = [0, 18], sizes = [8, 256], strides = [1, 1]} : vector<8x384xf32> to vector<8x256xf32>
    %35 = vector.extract_strided_slice %28 {offsets = [0, 32], sizes = [8, 256], strides = [1, 1]} : vector<8x384xf32> to vector<8x256xf32>
    %36 = vector.extract_strided_slice %28 {offsets = [0, 33], sizes = [8, 256], strides = [1, 1]} : vector<8x384xf32> to vector<8x256xf32>
    %37 = vector.extract_strided_slice %28 {offsets = [0, 34], sizes = [8, 256], strides = [1, 1]} : vector<8x384xf32> to vector<8x256xf32>
    %38 = tpu.concatenate %29, %30, %31, %32, %33, %34, %35, %36, %37 in 0 : vector<8x256xf32>, vector<8x256xf32>, vector<8x256xf32>, vector<8x256xf32>, vector<8x256xf32>, vector<8x256xf32>, vector<8x256xf32>, vector<8x256xf32>, vector<8x256xf32> -> vector<72x256xf32>
    %cst_15 = arith.constant dense<0.000000e+00> : vector<8x256xf32>
    %39 = tpu.matmul %0, %38, %cst_15 {dimension_numbers = #tpu.dot_dimension_numbers<[1], [0], [0], [1], [0, 0, 1, 1], [], []>} : vector<8x72xf32>, vector<72x256xf32>, vector<8x256xf32> -> vector<8x256xf32>
    %40 = vector.broadcast %1 : vector<8x1xf32> to vector<8x256xf32>
    %41 = arith.addf %39, %40 : vector<8x256xf32>
    %cst_16 = arith.constant 5.000000e-01 : f32
    %42 = vector.broadcast %cst_16 : f32 to vector<8x256xf32>
    %43 = arith.minimumf %41, %42 : vector<8x256xf32>
    %cst_17 = arith.constant 2.000000e+00 : f32
    %44 = vector.broadcast %cst_17 : f32 to vector<8x256xf32>
    %45 = arith.mulf %43, %44 : vector<8x256xf32>
    %46 = vector.broadcast %2 : vector<8x1xf32> to vector<8x256xf32>
    %47 = arith.addf %45, %46 : vector<8x256xf32>
    %c1_18 = arith.constant 1 : index
    %c0_19 = arith.constant 0 : index
    %c0_20 = arith.constant 0 : index
    %48 = vector.load %arg4[%c1_18, %c0_19, %c0_20] : memref<2x8x256xf32, #tpu.memory_space<vmem>>, vector<1x8x256xf32>
    %49 = vector.shape_cast %48 : vector<1x8x256xf32> to vector<8x256xf32>
    %50 = vector.shape_cast %47 : vector<8x256xf32> to vector<1x8x256xf32>
    tpu.vector_store %arg4[%c1_18, %c0_19, %c0_20], %50 {strides = array<i32>} : memref<2x8x256xf32, #tpu.memory_space<vmem>>, vector<1x8x256xf32>,
    return
  }
}

</mosaic_0001>

<bundles_post_ra>
// kernel: fused_conv_min_bias_scale.1
= control target key start
LH: loop header
LB: loop body
LE: loop exit
PB: predicated region body
PF: predicated region fallthrough
CT: control target
= control target key end

     0   :  { %s534_s27 = smov 127   ;;  %s535_s28 = smov 126   ;;  %v541_v9 = vmov 0.0   ;;  %v543_v10 = vmov 0   ;;  %vm32_vm0 = vcmask 1039360   ;;  %vm43_vm1 = vcmask 1031168   ;;  %s660_s0 = inlined_call_operand.vmem [shape: f32[2,8,384], index: 0, kind: input, shape index: {}]   ;;  %s661_s2 = inlined_call_operand.vmem [shape: f32[8,1], index: 2, kind: input, shape index: {}]   ;;  %s662_s3 = inlined_call_operand.vmem [shape: f32[8,1], index: 3, kind: input, shape index: {}]   ;;  %s663_s1 = inlined_call_operand.vmem [shape: f32[8,72], index: 1, kind: input, shape index: {}]   ;;  %s664_s4 = inlined_call_operand.vmem [shape: f32[2,8,256], index: 4, kind: output, shape index: {}]  }
   0x1   :  { %v572_v0 = vld [vmem:[%s660_s0 + $0x8] sm:$0xff]  ;;  %v22_v1 = vld [vmem:[%s660_s0 + $0x10] sm:$0xff]  ;;  %v580_v2 = vld [vmem:[%s660_s0] sm:$0xff]  ;;  %s536_s29 = smov 112   ;;  %s537_s30 = smov 111   ;;  %187 = vmatprep.mubr.f32.mxu0 %v541_v9  ;;  %358 = vmatprep.mubr.f32.mxu1 %v541_v9  ;;  %vm54_vm2 = vcmask 916480  }
   0x2   :  { %v427_v3 = vpack.i.bf16 %v22_v1, %v572_v0  ;;  %v586_v4 = vld [vmem:[%s660_s0 + $0x18] sm:$0xff]  ;;  %v591_v5 = vld [vmem:[%s660_s0 + $0x20] sm:$0xff]  ;;  %v381_v6 = vld [vmem:[%s660_s0 + $0x28] sm:$0xff]  ;;  %s538_s0 = smov 110   ;;  %s539_s5 = smov 96   ;;  %532 = vset.pattern.permute.xlu1 %v543_v10  ;;  %533 = vset.pattern.permute.xlu0 %v543_v10  ;;  %vm65_vm3 = vcmask 908288  }
   0x3   :  { %v437_v7 = vpack.i.bf16 %v586_v4, %v580_v2  ;;  %v432_v8 = vpack.i.bf16 %v381_v6, %v591_v5  ;;  %s540_s6 = smov 95   ;;  %s542_s7 = smov 94   ;;  %v18_v11 = vld [vmem:[%s661_s2] sm:$0xff]  ;;  %vm76_vm4 = vcmask 900096   ;;  %vm87_vm5 = vcmask 785408  }
   0x4   :  { %428 = vrot.lane.b32.xlu0 %v427_v3, %s534_s27  ;;  %v19_v12 = vld [vmem:[%s662_s3] sm:$0xff]  ;;  %vm98_vm6 = vcmask 777216   ;;  %vm109_vm7 = vcmask 769024   ;;  %vm119_vm8 = vcmask 588800  }
   0x5   :  { %438 = vrot.lane.b32.xlu1 %v437_v7, %s534_s27 }
   0x8   :  { %433 = vrot.lane.b32.xlu0 %v432_v8, %s534_s27 }
   0x9   :  { %443 = vrot.lane.b32.xlu1 %v427_v3, %s535_s28 }
   0xc   :  { %448 = vrot.lane.b32.xlu0 %v427_v3, %s536_s29 }
   0xd   :  { %453 = vrot.lane.b32.xlu1 %v432_v8, %s535_s28 }
  0x10   :  { %458 = vrot.lane.b32.xlu0 %v432_v8, %s536_s29 }
  0x11   :  { %463 = vrot.lane.b32.xlu1 %v437_v7, %s535_s28 }
  0x14   :  { %468 = vrot.lane.b32.xlu0 %v437_v7, %s536_s29 }
  0x15   :  { %473 = vrot.lane.b32.xlu1 %v427_v3, %s537_s30 }
  0x18   :  { %478 = vrot.lane.b32.xlu0 %v427_v3, %s538_s0 }
  0x19   :  { %483 = vrot.lane.b32.xlu1 %v432_v8, %s537_s30 }
  0x1c   :  { %488 = vrot.lane.b32.xlu0 %v432_v8, %s538_s0 }
  0x1d   :  { %493 = vrot.lane.b32.xlu1 %v437_v7, %s537_s30 }
  0x20   :  { %498 = vrot.lane.b32.xlu0 %v437_v7, %s538_s0 }
  0x21   :  { %503 = vrot.lane.b32.xlu1 %v427_v3, %s539_s5 }
  0x24   :  { %508 = vrot.lane.b32.xlu0 %v427_v3, %s540_s6 }
  0x25   :  { %513 = vrot.lane.b32.xlu1 %v432_v8, %s539_s5 }
  0x28   :  { %518 = vrot.lane.b32.xlu0 %v432_v8, %s540_s6 }
  0x29   :  { %523 = vrot.lane.b32.xlu1 %v437_v7, %s539_s5 }
  0x2c   :  { %528 = vrot.lane.b32.xlu0 %v437_v7, %s540_s6 }
  0x2d   :  { %105 = vrot.lane.b32.xlu1 %v572_v0, %s542_s7 }
  0x30   :  { %107 = vrot.lane.b32.xlu0 %v22_v1, %s542_s7 }
  0x31   :  { %286 = vrot.lane.b32.xlu1 %v591_v5, %s542_s7 }
  0x34   :  { %288 = vrot.lane.b32.xlu0 %v381_v6, %s542_s7 }
  0x35   :  { %103 = vrot.lane.b32.xlu1 %v580_v2, %s542_s7 }
  0x38   :  { %284 = vrot.lane.b32.xlu0 %v586_v4, %s542_s7 }
  0x39   :  { %116 = vperm.xlu1 %532, %v18_v11  }
  0x3c   :  { %200 = vperm.xlu0 %533, %v19_v12  }
  0x76   :  { %v429_v13 = vpop.permute.xlu0 %428 }
  0x77   :  { %v431_v14 = vunpack.i.h.bf16 %v429_v13  ;;  %v430_v15 = vunpack.i.l.bf16 %v429_v13  ;;  %v439_v16 = vpop.permute.xlu1 %438 }
  0x78   :  { %v440_v17 = vunpack.i.l.bf16 %v439_v16  ;;  %v441_v18 = vunpack.i.h.bf16 %v439_v16 }
  0x79   :  { %v34_v19 = vsel %vm32_vm0, %v430_v15, %v431_v14 }
  0x7a   :  { %v434_v20 = vpop.permute.xlu0 %433  ;;  %v385_v21 = vpack.c.bf16 %v34_v19, %v572_v0  ;;  %v33_v22 = vsel %vm32_vm0, %v440_v17, %v430_v15 }
  0x7b   :  { %v436_v23 = vunpack.i.h.bf16 %v434_v20  ;;  %v435_v24 = vunpack.i.l.bf16 %v434_v20  ;;  %v444_v25 = vpop.permute.xlu1 %443  ;;  %v387_v26 = vpack.c.bf16 %v33_v22, %v580_v2 }
  0x7c   :  { %v446_v27 = vunpack.i.h.bf16 %v444_v25  ;;  %v445_v28 = vunpack.i.l.bf16 %v444_v25  ;;  %386 = vmatprep.subr.bf16.mxu0 %v385_v21 }
  0x7d   :  { %388 = vmatpush1.bf16.msra.mxu0 %v387_v26  ;;  %v221_v29 = vsel %vm32_vm0, %v435_v24, %v436_v23  ;;  %v220_v30 = vsel %vm32_vm0, %v441_v18, %v435_v24 }
  0x7e   :  { %v449_v31 = vpop.permute.xlu0 %448  ;;  %v401_v32 = vpack.c.bf16 %v221_v29, %v591_v5  ;;  %v403_v33 = vpack.c.bf16 %v220_v30, %v586_v4  ;;  %v45_v37 = vsel %vm43_vm1, %v445_v28, %v446_v27 }
  0x7f   :  { %v451_v34 = vunpack.i.h.bf16 %v449_v31  ;;  %v450_v35 = vunpack.i.l.bf16 %v449_v31  ;;  %v454_v36 = vpop.permute.xlu1 %453 }
  0x80   :  { %v456_v38 = vunpack.i.h.bf16 %v454_v36  ;;  %v455_v39 = vunpack.i.l.bf16 %v454_v36  ;;  %402 = vmatprep.subr.bf16.mxu1 %v401_v32 }
  0x81   :  { %404 = vmatpush1.bf16.msra.mxu1 %v403_v33  ;;  %v56_v40 = vsel %vm54_vm2, %v450_v35, %v451_v34 }
  0x82   :  { %v459_v41 = vpop.permute.xlu0 %458  ;;  %v389_v42 = vpack.c.bf16 %v56_v40, %v45_v37  ;;  %v231_v46 = vsel %vm43_vm1, %v455_v39, %v456_v38 }
  0x83   :  { %v461_v43 = vunpack.i.h.bf16 %v459_v41  ;;  %v460_v44 = vunpack.i.l.bf16 %v459_v41  ;;  %v464_v45 = vpop.permute.xlu1 %463 }
  0x84   :  { %390 = vmatprep.subr.bf16.mxu0 %v389_v42  ;;  %v466_v47 = vunpack.i.h.bf16 %v464_v45  ;;  %v465_v48 = vunpack.i.l.bf16 %v464_v45 }
  0x85   :  { %v241_v49 = vsel %vm54_vm2, %v460_v44, %v461_v43 }
  0x86   :  { %v469_v50 = vpop.permute.xlu0 %468  ;;  %v405_v51 = vpack.c.bf16 %v241_v49, %v231_v46  ;;  %v44_v57 = vsel %vm43_vm1, %v465_v48, %v445_v28  ;;  %v230_v59 = vsel %vm43_vm1, %v466_v47, %v455_v39 }
  0x87   :  { %v471_v52 = vunpack.i.h.bf16 %v469_v50  ;;  %v470_v53 = vunpack.i.l.bf16 %v469_v50  ;;  %v474_v54 = vpop.permute.xlu1 %473 }
  0x88   :  { %v476_v55 = vunpack.i.h.bf16 %v474_v54  ;;  %v475_v56 = vunpack.i.l.bf16 %v474_v54  ;;  %406 = vmatprep.subr.bf16.mxu1 %v405_v51 }
  0x89   :  { %v55_v58 = vsel %vm54_vm2, %v470_v53, %v450_v35  ;;  %v240_v60 = vsel %vm54_vm2, %v471_v52, %v460_v44 }
  0x8a   :  { %v479_v61 = vpop.permute.xlu0 %478  ;;  %v391_v62 = vpack.c.bf16 %v55_v58, %v44_v57  ;;  %v407_v63 = vpack.c.bf16 %v240_v60, %v230_v59  ;;  %v67_v3 = vsel %vm65_vm3, %v475_v56, %v476_v55 }
  0x8b   :  { %v481_v0 = vunpack.i.h.bf16 %v479_v61  ;;  %v480_v1 = vunpack.i.l.bf16 %v479_v61  ;;  %v484_v2 = vpop.permute.xlu1 %483 }
  0x8c   :  { %v486_v4 = vunpack.i.h.bf16 %v484_v2  ;;  %v485_v5 = vunpack.i.l.bf16 %v484_v2  ;;  %392 = vmatpush1.bf16.msra.mxu0 %v391_v62  ;;  %408 = vmatpush1.bf16.msra.mxu1 %v407_v63  ;;  %v17_v63 = vld [vmem:[%s663_s1] sm:$0xff] }
  0x8d   :  { %v78_v6 = vsel %vm76_vm4, %v480_v1, %v481_v0 }
  0x8e   :  { %v489_v7 = vpop.permute.xlu0 %488  ;;  %v393_v8 = vpack.c.bf16 %v78_v6, %v67_v3  ;;  %v251_v12 = vsel %vm65_vm3, %v485_v5, %v486_v4 }
  0x8f   :  { %v491_v9 = vunpack.i.h.bf16 %v489_v7  ;;  %v490_v10 = vunpack.i.l.bf16 %v489_v7  ;;  %v494_v11 = vpop.permute.xlu1 %493 }
  0x90   :  { %394 = vmatprep.subr.bf16.mxu0 %v393_v8  ;;  %v496_v13 = vunpack.i.h.bf16 %v494_v11  ;;  %v495_v14 = vunpack.i.l.bf16 %v494_v11 }
  0x91   :  { %v261_v15 = vsel %vm76_vm4, %v490_v10, %v491_v9 }
  0x92   :  { %v499_v16 = vpop.permute.xlu0 %498  ;;  %v409_v17 = vpack.c.bf16 %v261_v15, %v251_v12  ;;  %v66_v23 = vsel %vm65_vm3, %v495_v14, %v475_v56  ;;  %v250_v25 = vsel %vm65_vm3, %v496_v13, %v485_v5 }
  0x93   :  { %v501_v18 = vunpack.i.h.bf16 %v499_v16  ;;  %v500_v19 = vunpack.i.l.bf16 %v499_v16  ;;  %v504_v20 = vpop.permute.xlu1 %503 }
  0x94   :  { %v506_v21 = vunpack.i.h.bf16 %v504_v20  ;;  %v505_v22 = vunpack.i.l.bf16 %v504_v20  ;;  %410 = vmatprep.subr.bf16.mxu1 %v409_v17 }
  0x95   :  { %v77_v24 = vsel %vm76_vm4, %v500_v19, %v480_v1  ;;  %v260_v26 = vsel %vm76_vm4, %v501_v18, %v490_v10 }
  0x96   :  { %v509_v27 = vpop.permute.xlu0 %508  ;;  %v395_v28 = vpack.c.bf16 %v77_v24, %v66_v23  ;;  %v411_v29 = vpack.c.bf16 %v260_v26, %v250_v25  ;;  %v89_v33 = vsel %vm87_vm5, %v505_v22, %v506_v21 }
  0x97   :  { %v511_v30 = vunpack.i.h.bf16 %v509_v27  ;;  %v510_v31 = vunpack.i.l.bf16 %v509_v27  ;;  %v514_v32 = vpop.permute.xlu1 %513 }
  0x98   :  { %v516_v34 = vunpack.i.h.bf16 %v514_v32  ;;  %v515_v35 = vunpack.i.l.bf16 %v514_v32  ;;  %396 = vmatpush1.bf16.msra.mxu0 %v395_v28  ;;  %412 = vmatpush1.bf16.msra.mxu1 %v411_v29 }
  0x99   :  { %v100_v36 = vsel %vm98_vm6, %v510_v31, %v511_v30 }
  0x9a   :  { %v519_v37 = vpop.permute.xlu0 %518  ;;  %v397_v38 = vpack.c.bf16 %v100_v36, %v89_v33  ;;  %v271_v42 = vsel %vm87_vm5, %v515_v35, %v516_v34 }
  0x9b   :  { %v521_v39 = vunpack.i.h.bf16 %v519_v37  ;;  %v520_v40 = vunpack.i.l.bf16 %v519_v37  ;;  %v524_v41 = vpop.permute.xlu1 %523 }
  0x9c   :  { %398 = vmatprep.subr.bf16.mxu0 %v397_v38  ;;  %v526_v43 = vunpack.i.h.bf16 %v524_v41  ;;  %v525_v44 = vunpack.i.l.bf16 %v524_v41 }
  0x9d   :  { %v281_v45 = vsel %vm98_vm6, %v520_v40, %v521_v39 }
  0x9e   :  { %v529_v46 = vpop.permute.xlu0 %528  ;;  %v413_v47 = vpack.c.bf16 %v281_v45, %v271_v42  ;;  %v88_v51 = vsel %vm87_vm5, %v525_v44, %v505_v22  ;;  %v270_v53 = vsel %vm87_vm5, %v526_v43, %v515_v35 }
  0x9f   :  { %v531_v48 = vunpack.i.h.bf16 %v529_v46  ;;  %v530_v49 = vunpack.i.l.bf16 %v529_v46  ;;  %v106_v50 = vpop.permute.xlu1 %105 }
  0xa0   :  { %414 = vmatprep.subr.bf16.mxu1 %v413_v47 }
  0xa1   :  { %v99_v52 = vsel %vm98_vm6, %v530_v49, %v510_v31  ;;  %v280_v54 = vsel %vm98_vm6, %v531_v48, %v520_v40 }
  0xa2   :  { %v108_v55 = vpop.permute.xlu0 %107  ;;  %v399_v56 = vpack.c.bf16 %v99_v52, %v88_v51  ;;  %v415_v57 = vpack.c.bf16 %v280_v54, %v270_v53 }
  0xa3   :  { %v287_v58 = vpop.permute.xlu1 %286  ;;  %v111_v59 = vsel %vm109_vm7, %v106_v50, %v108_v55 }
  0xa4   :  { %400 = vmatpush1.bf16.msra.mxu0 %v399_v56  ;;  %416 = vmatpush1.bf16.msra.mxu1 %v415_v57 }
  0xa5   :  { %139 = vmatprep.subr.mxu0 %v111_v59 }
  0xa6   :  { %v289_v60 = vpop.permute.xlu0 %288 }
  0xa7   :  { %v104_v61 = vpop.permute.xlu1 %103  ;;  %v291_v62 = vsel %vm109_vm7, %v287_v58, %v289_v60 }
  0xa8   :  { %v110_v0 = vsel %vm109_vm7, %v104_v61, %v106_v50  ;;  %310 = vmatprep.subr.mxu1 %v291_v62 }
  0xa9   :  { %140 = vmatpush1.msra.mxu0 %v110_v0 }
  0xaa   :  { %v285_v1 = vpop.permute.xlu0 %284  ;;  %378 = vmatmul.mubr.msk.f32.vlgmr.msra.gmra.mrb[0].mxu0 %vm119_vm8, %v17_v63 }
  0xab   :  { %v290_v2 = vsel %vm109_vm7, %v285_v1, %v287_v58 }
  0xac   :  { %311 = vmatpush1.msra.mxu1 %v290_v2 }
  0xad   :  { %382 = vmatmul.mubr.msk.f32.vlgmr.msra.gmra.mrb[0].mxu1 %vm119_vm8, %v17_v63 }
  0xb8   :  { %v117_v3 = vpop.permute.xlu1 %116 }
  0xbb   :  { %v201_v13 = vpop.permute.xlu0 %200 }
 0x17d   :  { %v189_v4 = vpop.f32.mrb[0].mxu0 }
 0x17e   :  { %v190_v5 = vadd.f32 %v189_v4, %v117_v3  ;;  %v191_v6 = vpop.f32.mrb[1].mxu0 }
 0x17f   :  { %v192_v7 = vadd.f32 %v191_v6, %v117_v3 }
 0x180   :  { %v194_v8 = vmin.f32 %v190_v5, 0.5  ;;  %v360_v9 = vpop.f32.mrb[0].mxu1 }
 0x181   :  { %v195_v10 = vmin.f32 %v192_v7, 0.5  ;;  %v361_v11 = vadd.f32 %v360_v9, %v117_v3  ;;  %v362_v12 = vpop.f32.mrb[1].mxu1 }
 0x182   :  { %v196_v14 = vmul.f32 2.0, %v194_v8  ;;  %v363_v15 = vadd.f32 %v362_v12, %v117_v3 }
 0x183   :  { %v197_v16 = vmul.f32 2.0, %v195_v10  ;;  %v365_v17 = vmin.f32 %v361_v11, 0.5 }
 0x184   :  { %v366_v18 = vmin.f32 %v363_v15, 0.5  ;;  %v203_v19 = vadd.f32 %v201_v13, %v196_v14 }
 0x185   :  { %v367_v20 = vmul.f32 2.0, %v365_v17  ;;  %v204_v21 = vadd.f32 %v201_v13, %v197_v16 }
 0x186   :  { %v368_v22 = vmul.f32 2.0, %v366_v18  ;;  %205 = vst [vmem:[%s664_s4] sm:$0xff] %v203_v19 }
 0x187   :  { %206 = vst [vmem:[%s664_s4 + $0x8] sm:$0xff] %v204_v21  ;;  %v369_v23 = vadd.f32 %v367_v20, %v201_v13 }
 0x188   :  { %v370_v24 = vadd.f32 %v368_v22, %v201_v13 }
 0x189   :  { %383 = vst [vmem:[%s664_s4 + $0x10] sm:$0xff] %v369_v23 }
 0x18a   :  { %384 = vst [vmem:[%s664_s4 + $0x18] sm:$0xff] %v370_v24 }

</bundles_post_ra>
